<compile_context>
chip_gen: v7x
topology: tpu7x:2x2x1
jax: 0.10.0
libtpu: 0.0.40
codegen_flags: <defaults>
</compile_context>

<pallas_src>
import functools

import jax
import jax.numpy as jnp
from jax import lax
from jax.experimental import pallas as pl
from jax.experimental.pallas import tpu as pltpu

HID = 16  # width of the collapsed hidden layer (linear3 output)


def mlp_kernel(x_ref, slab_ref, o_ref, *, in_dim):
    """Fused collapsed MLP.

    slab_ref rows (packed parameter slab, one resident DMA):
      [0 : in_dim)    W123 = W1@W2@W3                 (in_dim, 16)
      [in_dim]        b123 = b1@W2@W3 + b2@W3 + b3    (16,)
      [in_dim + 1]    w4 (final-layer weight, transposed row)
      [in_dim + 2]    [b4, 0, ..., 0]

    Output block is (1, 1, tile_b): batch folded into lanes (lane-dense store).
    """
    x = x_ref[...]                                   # (tile_b, in_dim)  f32 or bf16
    w123 = slab_ref[0:in_dim, :]                     # (in_dim, 16), same dtype as x

    # One MXU matmul for linear1 -> linear2 -> linear3.
    h = jnp.dot(x, w123, preferred_element_type=jnp.float32)          # (tile_b, 16) f32

    # Epilogue kept in f32 (v5e has no bf16 VPU/EUP).
    b123 = slab_ref[in_dim:in_dim + 1, :].astype(jnp.float32)         # (1, 16)
    w4_row = slab_ref[in_dim + 1:in_dim + 2, :].astype(jnp.float32)   # (1, 16)
    b4 = slab_ref[in_dim + 2:in_dim + 3, 0:1].astype(jnp.float32)     # (1, 1)

    h = jnp.maximum(h + b123, 0.0)                                    # ReLU

    # Final 16 -> 1 projection, produced lane-dense: contract dim 1 of (1,16)
    # with dim 1 of (tile_b,16)  ==  w4 @ h^T  ->  (1, tile_b).
    z = lax.dot_general(w4_row, h, (((1,), (1,)), ((), ())),
                        preferred_element_type=jnp.float32)           # (1, tile_b)
    z = z + b4

    # Sigmoid: exp goes to the EUP; exact reciprocal kept (approx=True would add
    # ~1e-4 abs error for no measurable gain in this HBM-bound kernel).
    sig = 1.0 / (1.0 + jnp.exp(-z))
    o_ref[...] = sig.reshape(o_ref.shape)                             # (1, 1, tile_b)


def pack_params(params, *, dtype=jnp.float32):
    """Collapse linear1..3 and pack ALL parameters into one slab.

    Call ONCE at parameter-setup time (not per forward): the per-call path then
    contains no tiny XLA matmul/pad/concat ops, which otherwise dominate wall
    time at small batch.
    """
    w123 = params["w1"] @ params["w2"] @ params["w3"]                          # (in, 16)
    b123 = (params["b1"] @ params["w2"] @ params["w3"]
            + params["b2"] @ params["w3"] + params["b3"])                      # (1, 16)
    hid = w123.shape[1]
    out_dim = params["w4"].shape[1]
    assert out_dim == 1 and hid == HID, "fast path specialized for the 16->1 head"
    b4_row = jnp.pad(params["b4"], ((0, 0), (0, hid - out_dim)))               # (1, 16)
    slab = jnp.concatenate([w123, b123, params["w4"].T, b4_row], axis=0)       # (in+3,16)
    return slab.astype(dtype)


def yeram_model_forward(x, slab, *, tile_b=2048):
    """x: (B, in_dim) f32 or bf16.  slab: packed params from pack_params().

    Returns (B, 1) float32 sigmoid probabilities.
    """
    B, in_dim = x.shape
    assert slab.shape == (in_dim + 3, HID)
    assert tile_b % 8 == 0

    x = x.astype(slab.dtype)

    # Batch tiling: pad B to a sublane multiple, then to a tile multiple.
    b_pad = ((B + 7) // 8) * 8
    if b_pad <= tile_b:
        tile_b = b_pad
    else:
        b_pad = ((b_pad + tile_b - 1) // tile_b) * tile_b
    if b_pad != B:
        x = jnp.pad(x, ((0, b_pad - B), (0, 0)))
    num_tiles = b_pad // tile_b
    # NOTE(v7x): at production batch keep num_tiles >= 2 (ideally even) so the
    # "parallel" grid axis actually shards across both TensorCores.

    itemsize = jnp.dtype(x.dtype).itemsize
    cost = pl.CostEstimate(
        flops=2 * b_pad * HID * (in_dim + 1),
        transcendentals=b_pad,
        bytes_accessed=b_pad * in_dim * itemsize + slab.size * itemsize + b_pad * 4,
    )

    # Deepen input pipelining only when there are enough steps to pipeline;
    # per-step compute is much smaller than the per-step x DMA.
    if num_tiles >= 3:
        x_spec = pl.BlockSpec((tile_b, in_dim), lambda i: (i, 0),
                              pipeline_mode=pl.Buffered(3))
    else:
        x_spec = pl.BlockSpec((tile_b, in_dim), lambda i: (i, 0))

    out = pl.pallas_call(
        functools.partial(mlp_kernel, in_dim=in_dim),
        out_shape=jax.ShapeDtypeStruct((num_tiles, 1, tile_b), jnp.float32),
        grid=(num_tiles,),
        in_specs=[
            x_spec,                                       # x tile, pipelined
            pl.BlockSpec(slab.shape, lambda i: (0, 0)),   # packed weights, resident
        ],
        out_specs=pl.BlockSpec((1, 1, tile_b), lambda i: (i, 0, 0)),  # lane-dense
        compiler_params=pltpu.CompilerParams(
            dimension_semantics=("parallel",),        # shards tiles across v7x's 2 TCs
            vmem_limit_bytes=48 * 1024 * 1024,        # headroom on v7x (64 MiB physical)
        ),
        cost_estimate=cost,
    )(x, slab)

    # (num_tiles, 1, tile_b) -> (B, 1); tiles are in batch order.
    return out.reshape(b_pad)[:B].reshape(B, 1)


def init_params(key, input_dim, output_dim):
    """Deterministic init mimicking PyTorch nn.Linear default (U(+/- 1/sqrt(fan_in))).
    Weights are stored transposed: (in_features, out_features); biases (1, out)."""
    dims = [(input_dim, 32), (32, 32), (32, 16), (16, output_dim)]
    params = {}
    for idx, (fan_in, fan_out) in enumerate(dims, start=1):
        key, kw, kb = jax.random.split(key, 3)
        bound = 1.0 / jnp.sqrt(fan_in)
        params[f"w{idx}"] = jax.random.uniform(
            kw, (fan_in, fan_out), jnp.float32, minval=-bound, maxval=bound)
        params[f"b{idx}"] = jax.random.uniform(
            kb, (1, fan_out), jnp.float32, minval=-bound, maxval=bound)
    return params


def reference_forward(x, params):
    """Pure-JAX reference matching the original (un-collapsed) PyTorch forward."""
    h = x @ params["w1"] + params["b1"]
    h = h @ params["w2"] + params["b2"]
    h = h @ params["w3"] + params["b3"]
    h = jnp.maximum(h, 0.0)
    h = h @ params["w4"] + params["b4"]
    return jax.nn.sigmoid(h)


if __name__ == "__main__":
    key = jax.random.PRNGKey(0)
    key, kx, kx2 = jax.random.split(key, 3)

    input_dim, output_dim = 30, 1   # breast-cancer feature count, binary head
    params = init_params(key, input_dim, output_dim)

    # ---- small-batch correctness check (f32: original-module semantics) ----
    batch = 8
    x = jax.random.normal(kx, (batch, input_dim), dtype=jnp.float32)
    slab_f32 = pack_params(params, dtype=jnp.float32)      # packed ONCE, reused per call
    fwd = jax.jit(functools.partial(yeram_model_forward, tile_b=2048))
    out = jax.block_until_ready(fwd(x, slab_f32))
    ref = reference_forward(x, params)
    assert out.shape == (batch, output_dim)
    # Collapsing linear1-3 reassociates fp32 accumulation; tolerance covers that.
    assert jnp.allclose(out, ref, atol=3e-5, rtol=3e-5), "f32 mismatch vs reference"

    # ---- production-shaped check: bf16 inputs, multi-tile grid, Buffered(3) ----
    big_batch = 4096
    xb = jax.random.normal(kx2, (big_batch, input_dim), dtype=jnp.float32)
    slab_bf16 = pack_params(params, dtype=jnp.bfloat16)
    fwd_big = jax.jit(functools.partial(yeram_model_forward, tile_b=1024))
    out_big = jax.block_until_ready(fwd_big(xb.astype(jnp.bfloat16), slab_bf16))
    ref_big = reference_forward(xb, params)
    assert out_big.shape == (big_batch, output_dim)
    assert jnp.allclose(out_big, ref_big, atol=2e-2, rtol=2e-2), "bf16 mismatch vs reference"

    print("KERNEL_OK")
</pallas_src>

<mosaic_0001>
module attributes {stable_mosaic.version = 11 : i64} {
  func.func @mlp_kernel(%arg0: i32, %arg1: memref<8x30xf32, #tpu.memory_space<vmem>>, %arg2: memref<33x16xf32, #tpu.memory_space<vmem>>, %arg3: memref<1x1x8xf32, #tpu.memory_space<vmem>>) attributes {dimension_semantics = [#tpu.dimension_semantics<parallel>], iteration_bounds = array<i64: 1>, scalar_prefetch = 0 : i64, scratch_operands = 0 : i64, tpu.core_type = #tpu.core_type<tc>, window_params = [{transform_indices = @transform_0, window_bounds = array<i64: 8, 30>}, {pipeline_mode = #tpu.pipeline_mode<synchronous>, transform_indices = @transform_1, window_bounds = array<i64: 33, 16>}, {transform_indices = @transform_2, window_bounds = array<i64: 1, 1, 8>}]} {
    %c0 = arith.constant 0 : index
    %c0_0 = arith.constant 0 : index
    %0 = vector.load %arg1[%c0, %c0_0] : memref<8x30xf32, #tpu.memory_space<vmem>>, vector<8x30xf32>
    %c0_1 = arith.constant 0 : index
    %c0_2 = arith.constant 0 : index
    %1 = vector.load %arg2[%c0_1, %c0_2] : memref<33x16xf32, #tpu.memory_space<vmem>>, vector<30x16xf32>
    %cst = arith.constant dense<0.000000e+00> : vector<8x16xf32>
    %2 = tpu.matmul %0, %1, %cst {dimension_numbers = #tpu.dot_dimension_numbers<[1], [0], [0], [1], [0, 0, 1, 1], [], []>} : vector<8x30xf32>, vector<30x16xf32>, vector<8x16xf32> -> vector<8x16xf32>
    %c30 = arith.constant 30 : index
    %c0_3 = arith.constant 0 : index
    %3 = vector.load %arg2[%c30, %c0_3] : memref<33x16xf32, #tpu.memory_space<vmem>>, vector<1x16xf32>
    %c31 = arith.constant 31 : index
    %c0_4 = arith.constant 0 : index
    %4 = vector.load %arg2[%c31, %c0_4] : memref<33x16xf32, #tpu.memory_space<vmem>>, vector<1x16xf32>
    %c32 = arith.constant 32 : index
    %c0_5 = arith.constant 0 : index
    %5 = vector.load %arg2[%c32, %c0_5] : memref<33x16xf32, #tpu.memory_space<vmem>>, vector<1x1xf32>
    %6 = vector.broadcast %3 : vector<1x16xf32> to vector<8x16xf32>
    %7 = arith.addf %2, %6 : vector<8x16xf32>
    %cst_6 = arith.constant 0.000000e+00 : f32
    %8 = vector.broadcast %cst_6 : f32 to vector<8x16xf32>
    %9 = arith.maximumf %7, %8 : vector<8x16xf32>
    %cst_7 = arith.constant dense<0.000000e+00> : vector<1x8xf32>
    %10 = tpu.matmul %4, %9, %cst_7 {dimension_numbers = #tpu.dot_dimension_numbers<[1], [1], [0], [0], [0, 0, 1, 0], [], []>} : vector<1x16xf32>, vector<8x16xf32>, vector<1x8xf32> -> vector<1x8xf32>
    %11 = vector.broadcast %5 : vector<1x1xf32> to vector<1x8xf32>
    %12 = arith.addf %10, %11 : vector<1x8xf32>
    %cst_8 = arith.constant 0.000000e+00 : f32
    %13 = vector.broadcast %cst_8 : f32 to vector<1x8xf32>
    %14 = arith.subf %13, %12 : vector<1x8xf32>
    %15 = math.exp %14 : vector<1x8xf32>
    %cst_9 = arith.constant 1.000000e+00 : f32
    %16 = vector.broadcast %cst_9 : f32 to vector<1x8xf32>
    %17 = arith.addf %16, %15 : vector<1x8xf32>
    %cst_10 = arith.constant 1.000000e+00 : f32
    %18 = vector.broadcast %cst_10 : f32 to vector<1x8xf32>
    %19 = arith.divf %18, %17 : vector<1x8xf32>
    %20 = vector.shape_cast %19 : vector<1x8xf32> to vector<1x1x8xf32>
    %c0_11 = arith.constant 0 : index
    %c0_12 = arith.constant 0 : index
    %c0_13 = arith.constant 0 : index
    %21 = vector.load %arg3[%c0_11, %c0_12, %c0_13] : memref<1x1x8xf32, #tpu.memory_space<vmem>>, vector<1x1x8xf32>
    tpu.vector_store %arg3[%c0_11, %c0_12, %c0_13], %20 {strides = array<i32>} : memref<1x1x8xf32, #tpu.memory_space<vmem>>, vector<1x1x8xf32>,
    return
  }
  func.func @transform_0(%arg0: i32) -> (i32, i32) {
    %c0_i32 = arith.constant 0 : i32
    %c0_i32_0 = arith.constant 0 : i32
    return %arg0, %c0_i32 : i32, i32
  }
  func.func @transform_1(%arg0: i32) -> (i32, i32) {
    %c0_i32 = arith.constant 0 : i32
    %c0_i32_0 = arith.constant 0 : i32
    %c0_i32_1 = arith.constant 0 : i32
    return %c0_i32, %c0_i32_0 : i32, i32
  }
  func.func @transform_2(%arg0: i32) -> (i32, i32, i32) {
    %c0_i32 = arith.constant 0 : i32
    %c0_i32_0 = arith.constant 0 : i32
    %c0_i32_1 = arith.constant 0 : i32
    return %arg0, %c0_i32, %c0_i32_0 : i32, i32, i32
  }
}

</mosaic_0001>

<bundles_post_ra>
// kernel: yeram_model_forward.1
= control target key start
LH: loop header
LB: loop body
LE: loop exit
PB: predicated region body
PF: predicated region fallthrough
CT: control target
= control target key end

     0   :  { %vm28_vm0 = vcmask 1045504   ;;  %v277_v3 = vmov 0.0|0.0   ;;  %vm278_vm1 = vmmov 0   ;;  %v279_v6 = vmov 0.0   ;;  %s335_s0 = inlined_call_operand.vmem [shape: f32[8,30], index: 0, kind: input, shape index: {}]   ;;  %s336_s1 = inlined_call_operand.vmem [shape: f32[33,16], index: 1, kind: input, shape index: {}]   ;;  %s337_s2 = inlined_call_operand.hbm [shape: f32[1,1,8], index: 2, kind: output, shape index: {}]  }
   0x1   :  { %v13_v0 = vld [vmem:[%s336_s1] sm:$0xff]  ;;  %v14_v1 = vld [vmem:[%s336_s1 + $0x8] sm:$0xff]  ;;  %v15_v2 = vld [vmem:[%s336_s1 + $0x10] sm:$0xff]  ;;  %235 = vmatprep.subr.bf16.mxu0 %v277_v3  ;;  %227 = vmatprep.mubr.msk.f32.mxu0 %vm278_vm1, %v279_v6 }
   0x2   :  { %v236_v4 = vpack.c.bf16 %v14_v1, %v13_v0  ;;  %v16_v5 = vld [vmem:[%s336_s1 + $0x18] sm:$0x3f]  ;;  %230 = vmatprep.subr.mxu1 %v279_v6 }
   0x3   :  { %7 = vsyncpa [#allocation3], 0  ;;  %v239_v7 = vpack.c.bf16 %v16_v5, %v15_v2  ;;  %232 = vmatprep.mubr.msk.f32.mxu1 %vm278_vm1, %v279_v6  ;;  %vm280_vm2 = vmmov 1   ;;  %v12_v8 = vld [vmem:[%s335_s0] sm:$0xff]  ;;  %vm24_vm4 = vcmask 244736   ;;  %v281_v10 = vmov 0  }
   0x4   :  { %237 = vmatpush3.bf16.msra.mxu0 %v236_v4  ;;  %vm240_vm3 = vmpackc.low %vm28_vm0, %vm280_vm2  ;;  %v19_v9 = vld [vmem:[%s336_s1 + $0x20] sm:$0x1]  ;;  %248 = vset.pattern.permute.xlu0 %v281_v10  ;;  %v207_v11 = vld [vmem:[%s336_s1 + $0x1e] ss:$0 sm:$0xff]  ;;  %vm108_vm5 = vcmask 130048   ;;  %s282_s24 = smov [#allocation2]  }
   0x5   :  { %238 = vmatprep.subr.bf16.mxu0 %v277_v3  ;;  %105 = vperm.xlu0 %248, %v19_v9   ;;  %v18_v16 = vld [vmem:[%s336_s1 + $0x1f] sm:$0x1]  ;;  %s199_s25 = sshll.u32 %s282_s24, 4  ;;  %vm191_vm6 = vcmask 57344   ;;  %s200_s25 = int_to_ptr.vmem [resolvable:$true] %s199_s25 }
   0x6   :  { %s253_s26 = scalar_lea.vmem %s200_s25, 16  ;;  %s257_s1 = scalar_lea.vmem %s200_s25, 32 }
   0x7   :  { %p254_p0 = scmp.ne.s32.totalorder %s200_s25, %s253_s26  ;;  %p258_p1 = scmp.lt.s32.totalorder %s200_s25, %s200_s25 }
   0x8   :  { %241 = vmatpush3.bf16.msk.msra.mxu0 %vm240_vm3, %v239_v7  ;;  %p259_p2 = scmp.lt.s32.totalorder %s257_s1, %s253_s26 }
   0xa   :  { %p260_p3 = por %p259_p2, %p258_p1 }
   0xb   :  { %228 = vmatmul.mubr.msk.f32.vlgmr.msra.gmra.mrb[0].mxu0 %vm24_vm4, %v12_v8 }
   0xc   :  { %p261_p4 = pnand %p260_p3, %p254_p0 }
  0x84   :  { %v106_v17 = vpop.permute.xlu0 %105 }
  0xde   :  { %v98_v12 = vpop.f32.mrb[0].mxu0 }
  0xdf   :  { %v99_v13 = vadd.f32 %v207_v11, %v98_v12  ;;  %v229_v14 = vpop.f32.mrb[1].mxu0 }
  0xe1   :  { %v102_v15 = vmax.f32 %v99_v13, 0.0 }
  0xe3   :  { %231 = vmatpush3.xpose.msk.msra.mxu1 %vm108_vm5, %v102_v15 }
  0xe6   :  { %233 = vmatmul.mubr.msk.f32.vlgmr.msra.gmra.mrb[0].mxu1 %vm108_vm5, %v18_v16 }
 0x1b9   :  { %v181_v18 = vpop.f32.mrb[0].mxu1 }
 0x1ba   :  { %v182_v19 = vadd.f32 %v181_v18, %v106_v17  ;;  %v234_v20 = vpop.f32.mrb[1].mxu1 }
 0x1bc   :  { %v185_v21 = vsub.f32 0.0, %v182_v19 }
 0x1be   :  { %v186_v22 = vmul.f32 1.442695, %v185_v21 }
 0x1c0   :  { %249 = vpow2.f32 %v186_v22 }
 0x1ca   :  { %v250_v23 = vpop.eup %249 }
 0x1cb   :  { %v188_v24 = vadd.f32 1.0, %v250_v23 }
 0x1cd   :  { %251 = vrcp.f32 %v188_v24 }
 0x1d7   :  { %v252_v25 = vpop.eup %251 }
 0x1d8   :  { %192 = vst.msk [vmem:[#allocation2] sm:$0x1] %vm191_vm6, %v252_v25 }
 0x1d9   :  { %264 = shalt.err (!%p261_p4)
}
 0x1da   :  { %s265_s29 = scalar_lea.hbm %s337_s2, 16 }
 0x1db   :  { %p266_p5 = scmp.ne.s32.totalorder %s337_s2, %s265_s29  ;;  %p269_p6 = scmp.lt.u32.totalorder %s265_s29, %s337_s2 }
 0x1dd   :  { %p271_p7 = pnand %p269_p6, %p266_p5 }
 0x1df   :  { %274 = shalt.err (!%p271_p7)
}
 0x1e0   :  { %202 = dma.vmem_to_hbm [thread:$0]  %s200_s25, 16, %s337_s2, [#allocation3]  }
 0x1e1   :  { %275 = dma.done.wait [#allocation3], 16  }
 0x1e2   :  { %276 = vsyncadd [#allocation3], 4294967280 }
 0x1e3   :  { %206 = vsyncpa [#allocation3], 1 }

</bundles_post_ra>
